<compile_context>
chip_gen: v6e
topology: v6e:2x2x1
jax: 0.10.0
libtpu: 0.0.40
codegen_flags: <defaults>
</compile_context>

<pallas_src>
import functools

import jax
import jax.numpy as jnp
import numpy as np
from jax.experimental import pallas as pl
from jax.experimental.pallas import tpu as pltpu

EPS = 1e-8  # matches the PyTorch module (only used on the unimplemented sort path)


# --------------------------------------------------------------------------- #
# Kernels
# --------------------------------------------------------------------------- #
def _phi_from_reads(rw, fgda, n_reads, n_cells):
    """phi[b, c] = prod_r (1 - fg[b, r] * rw[b, r, c]); all math in f32.

    rw is a lane-dense [TB, R*N] f32 slab (each per-r slice is 128-aligned);
    fgda is [TB, R+1] f32 with free_gates in columns 0..R-1.
    """
    N = n_cells
    phi = 1.0 - fgda[:, 0:1] * rw[:, 0:N]
    for r in range(1, n_reads):
        phi = phi * (1.0 - fgda[:, r:r + 1] * rw[:, r * N:(r + 1) * N])
    return phi


def _softmax_lanes(scores):
    """Row-wise softmax over the lane (cells) dimension, in f32."""
    m = jnp.max(scores, axis=-1, keepdims=True)
    e = jnp.exp(scores - m)
    # Exact divide keeps the 1e-5 verification tight; this kernel is DMA-bound
    # so the EUP-approx reciprocal would not change wall clock.
    return e / jnp.sum(e, axis=-1, keepdims=True)


def _alloc_step_kernel(rw_ref, fgda_ref, ww_ref, us_ref,
                       alloc_ref, phi_ref, us_out_ref, *, n_reads, n_cells):
    """General (non-first) timestep; every ref holds a [TB, ...] batch tile."""
    rw = rw_ref[...].astype(jnp.float32)
    fgda = fgda_ref[...].astype(jnp.float32)

    phi = _phi_from_reads(rw, fgda, n_reads, n_cells)
    phi_ref[...] = phi.astype(phi_ref.dtype)

    # usages' = (usages + write_weights * (1 - usages)) * phi
    u = us_ref[...].astype(jnp.float32)
    w = ww_ref[...].astype(jnp.float32)
    u_new = (u + w * (1.0 - u)) * phi
    us_out_ref[...] = u_new.astype(us_out_ref.dtype)

    # alloc = softmax((1 - usages') * diff_alloc) over cells (lane dim)
    da = fgda[:, n_reads:n_reads + 1]                 # [TB,1] lane-broadcast
    scores = (1.0 - u_new) * da
    alloc_ref[...] = _softmax_lanes(scores).astype(alloc_ref.dtype)


def _alloc_first_step_kernel(rw_ref, fgda_ref,
                             alloc_ref, phi_ref, us_out_ref, *, n_reads, n_cells):
    """First timestep (PyTorch: write_weights is None, self.usages is None)."""
    rw = rw_ref[...].astype(jnp.float32)
    fgda = fgda_ref[...].astype(jnp.float32)

    phi = _phi_from_reads(rw, fgda, n_reads, n_cells)
    phi_ref[...] = phi.astype(phi_ref.dtype)

    us_out_ref[...] = jnp.zeros_like(us_out_ref)

    cell = jax.lax.broadcasted_iota(jnp.int32, alloc_ref.shape, 1)
    one_minus_usage = jnp.where(cell == 0, 1.0, 0.0).astype(jnp.float32)
    da = fgda[:, n_reads:n_reads + 1]
    scores = one_minus_usage * da
    alloc_ref[...] = _softmax_lanes(scores).astype(alloc_ref.dtype)


# --------------------------------------------------------------------------- #
# Tiling / topology helpers
# --------------------------------------------------------------------------- #
def _tpu_topology():
    """Best-effort (VMEM capacity bytes, multi-TensorCore chip?) query."""
    vmem_cap = 128 << 20  # v5e/v6e physical VMEM; safe upper default
    try:
        info = pltpu.get_tpu_info()
        vmem_cap = int(getattr(info, "vmem_capacity_bytes", vmem_cap))
    except Exception:
        pass
    multi_tc = False
    try:
        kind = jax.devices()[0].device_kind.lower()
        multi_tc = ("v4" in kind) or ("v5p" in kind) or ("v7" in kind) or ("7x" in kind)
    except Exception:
        pass
    return vmem_cap, multi_tc


def _lanes_per_row(n_reads, n_cells):
    """Per-batch-row VMEM lane count across all pipelined streams (step kernel):
    rw slab (R*N) + write_weights (N) + usages (N) + 3 outputs (3N) +
    the fg|da stream lane-padded to 128."""
    return n_reads * n_cells + 5 * n_cells + 128


def _pick_batch_tile(batch_padded, n_reads, n_cells, itemsize, vmem_cap, multi_tc):
    """Batch tile from a VMEM byte budget; >=2 grid steps only on multi-TC
    chips with large batches (single-TC chips prefer one big block)."""
    bytes_per_row = 2 * itemsize * _lanes_per_row(n_reads, n_cells)  # double buffered
    budget = max(4 << 20, min(vmem_cap // 4, 24 << 20))
    tb = (budget // bytes_per_row) // 8 * 8
    tb = max(8, min(tb, batch_padded))
    if multi_tc and batch_padded >= 1024:
        # Split across the two TensorCores: at least two grid steps, big blocks.
        half = pl.cdiv(batch_padded // 2, 8) * 8
        tb = max(8, min(tb, half))
    return tb


# --------------------------------------------------------------------------- #
# Wrapper
# --------------------------------------------------------------------------- #
def allocation_addressing(read_weights, free_gates, diff_alloc,
                          write_weights=None, usages=None, write_gate=None,
                          *, batch_tile=None):
    """Functional AllocationAddressing.forward (diff_alloc path).

    Args:
      read_weights:  [B, R, N] previous read weightings.
      free_gates:    [B, R]    free gates in [0, 1].
      diff_alloc:    [B, 1]    sharpening parameter (must not be None).
      write_weights: [B, N] previous write weighting, or None on the first step.
      usages:        [B, N] previous usage vector, or None on the first step.
                     NOTE: aliased to the returned new-usages output — do not
                     reuse the passed buffer afterwards (donate it under jit).
      write_gate:    accepted for signature parity; unused by the PyTorch forward.

    Returns:
      (alloc_dist [B, N], phi [B, N], new_usages [B, N])
    """
    del write_gate  # the PyTorch forward never uses it
    if diff_alloc is None:
        # TODO(synk): sorted free-list allocation (sort + cumprod + scatter).
        raise NotImplementedError("diff_alloc=None path is not implemented")

    B, R, N = read_weights.shape
    dtype = read_weights.dtype
    itemsize = jnp.dtype(dtype).itemsize

    vmem_cap, multi_tc = _tpu_topology()
    b8 = pl.cdiv(B, 8) * 8                              # sublane-align the batch
    tb = batch_tile if batch_tile is not None else _pick_batch_tile(
        b8, R, N, itemsize, vmem_cap, multi_tc)
    grid_steps = pl.cdiv(b8, tb)
    bp = grid_steps * tb                                # padded batch (full blocks)

    # Lane-dense slab: [B, R, N] -> [B, R*N]; merge the tiny free_gates and
    # diff_alloc streams into one [B, R+1] input (one DMA stream, one lane pad).
    rw2 = read_weights.reshape(B, R * N)
    fgda = jnp.concatenate(
        [free_gates.astype(dtype), diff_alloc.reshape(B, 1).astype(dtype)], axis=-1)

    def _pad(x):
        if bp == B:
            return x
        return jnp.pad(x, ((0, bp - B),) + ((0, 0),) * (x.ndim - 1))

    rw2, fgda = _pad(rw2), _pad(fgda)

    row_spec = pl.BlockSpec((tb, N), lambda i: (i, 0))
    rw_spec = pl.BlockSpec((tb, R * N), lambda i: (i, 0))
    fgda_spec = pl.BlockSpec((tb, R + 1), lambda i: (i, 0))

    out_shape = (jax.ShapeDtypeStruct((bp, N), dtype),   # alloc_dist
                 jax.ShapeDtypeStruct((bp, N), dtype),   # phi
                 jax.ShapeDtypeStruct((bp, N), dtype))   # new usages
    out_specs = (row_spec, row_spec, row_spec)

    # Scoped-VMEM limit from the actual double-buffered footprint (+ headroom),
    # never below the common 32 MiB default, never above physical capacity.
    vmem_use = 2 * itemsize * tb * _lanes_per_row(R, N)
    vmem_limit = int(min(vmem_cap, max(32 << 20, vmem_use + (4 << 20))))
    cparams = pltpu.CompilerParams(dimension_semantics=("parallel",),
                                   vmem_limit_bytes=vmem_limit)

    if write_weights is None:
        assert usages is None, "first step expects write_weights and usages both None"
        kernel = functools.partial(_alloc_first_step_kernel, n_reads=R, n_cells=N)
        outs = pl.pallas_call(
            kernel, out_shape=out_shape, grid=(grid_steps,),
            in_specs=[rw_spec, fgda_spec],
            out_specs=out_specs, compiler_params=cparams,
        )(rw2, fgda)
    else:
        ww, us = _pad(write_weights), _pad(usages)
        kernel = functools.partial(_alloc_step_kernel, n_reads=R, n_cells=N)
        outs = pl.pallas_call(
            kernel, out_shape=out_shape, grid=(grid_steps,),
            in_specs=[rw_spec, fgda_spec, row_spec, row_spec],
            out_specs=out_specs,
            # DNC updates `usages` in place across timesteps: alias the carried
            # usage state to its output so no second HBM buffer is needed.
            input_output_aliases={3: 2},
            compiler_params=cparams,
        )(rw2, fgda, ww, us)

    if bp != B:
        outs = tuple(o[:B] for o in outs)
    return outs


# --------------------------------------------------------------------------- #
# Pure-JAX reference + self-test
# --------------------------------------------------------------------------- #
def allocation_addressing_reference(read_weights, free_gates, diff_alloc,
                                    write_weights=None, usages=None):
    """Pure-JAX replica of the PyTorch forward (diff_alloc path) for checking."""
    B, R, N = read_weights.shape
    phi = jnp.prod(1.0 - free_gates[:, :, None] * read_weights, axis=1)
    if write_weights is None:
        new_usages = jnp.zeros((B, N), read_weights.dtype)
        one_minus_usage = jnp.zeros((B, N), read_weights.dtype).at[:, 0].set(1.0)
    else:
        new_usages = (usages + write_weights * (1.0 - usages)) * phi
        one_minus_usage = 1.0 - new_usages
    alloc = jax.nn.softmax(one_minus_usage * diff_alloc, axis=-1)
    return alloc, phi, new_usages


def _make_inputs(key, B, R, N):
    k_rw, k_fg, k_da, k_ww, k_us = jax.random.split(key, 5)
    read_weights = jax.nn.softmax(
        jax.random.normal(k_rw, (B, R, N), dtype=jnp.float32), axis=-1)
    free_gates = jax.nn.sigmoid(jax.random.normal(k_fg, (B, R), dtype=jnp.float32))
    diff_alloc = 1.0 + jax.nn.softplus(
        jax.random.normal(k_da, (B, 1), dtype=jnp.float32))
    write_weights = jax.nn.softmax(
        jax.random.normal(k_ww, (B, N), dtype=jnp.float32), axis=-1)
    usages = jax.nn.sigmoid(jax.random.normal(k_us, (B, N), dtype=jnp.float32))
    return read_weights, free_gates, diff_alloc, write_weights, usages


if __name__ == "__main__":
    R, N = 4, 128   # read heads, memory cells
    key = jax.random.PRNGKey(0)
    k0, k1 = jax.random.split(key)

    # Case 1: B = 16 (sublane aligned, single block).
    rw, fg, da, ww, us = _make_inputs(k0, 16, R, N)
    ref_first = allocation_addressing_reference(rw, fg, da)
    ref_step = allocation_addressing_reference(rw, fg, da, write_weights=ww, usages=us)
    out_first = jax.block_until_ready(allocation_addressing(rw, fg, da))
    out_step = jax.block_until_ready(
        allocation_addressing(rw, fg, da, write_weights=ww, usages=us))
    for got, want in zip(out_first + out_step, ref_first + ref_step):
        np.testing.assert_allclose(np.asarray(got), np.asarray(want),
                                   rtol=1e-5, atol=1e-6)

    # Case 2: B = 20 (ragged batch -> wrapper pads to the tile and slices back).
    rw, fg, da, ww, us = _make_inputs(k1, 20, R, N)
    ref_step = allocation_addressing_reference(rw, fg, da, write_weights=ww, usages=us)
    out_step = jax.block_until_ready(
        allocation_addressing(rw, fg, da, write_weights=ww, usages=us))
    for got, want in zip(out_step, ref_step):
        np.testing.assert_allclose(np.asarray(got), np.asarray(want),
                                   rtol=1e-5, atol=1e-6)

    print("KERNEL_OK")
</pallas_src>

<mosaic_0001>
module attributes {stable_mosaic.version = 11 : i64} {
  func.func @_alloc_first_step_kernel(%arg0: i32, %arg1: memref<16x512xf32, #tpu.memory_space<vmem>>, %arg2: memref<16x5xf32, #tpu.memory_space<vmem>>, %arg3: memref<16x128xf32, #tpu.memory_space<vmem>>, %arg4: memref<16x128xf32, #tpu.memory_space<vmem>>, %arg5: memref<16x128xf32, #tpu.memory_space<vmem>>) attributes {dimension_semantics = [#tpu.dimension_semantics<parallel>], iteration_bounds = array<i64: 1>, scalar_prefetch = 0 : i64, scratch_operands = 0 : i64, tpu.core_type = #tpu.core_type<tc>, window_params = [{transform_indices = @transform_0, window_bounds = array<i64: 16, 512>}, {transform_indices = @transform_1, window_bounds = array<i64: 16, 5>}, {transform_indices = @transform_2, window_bounds = array<i64: 16, 128>}, {transform_indices = @transform_3, window_bounds = array<i64: 16, 128>}, {transform_indices = @transform_4, window_bounds = array<i64: 16, 128>}]} {
    %c0 = arith.constant 0 : index
    %c0_0 = arith.constant 0 : index
    %0 = vector.load %arg1[%c0, %c0_0] : memref<16x512xf32, #tpu.memory_space<vmem>>, vector<16x512xf32>
    %c0_1 = arith.constant 0 : index
    %c0_2 = arith.constant 0 : index
    %1 = vector.load %arg2[%c0_1, %c0_2] : memref<16x5xf32, #tpu.memory_space<vmem>>, vector<16x5xf32>
    %2 = vector.extract_strided_slice %1 {offsets = [0, 0], sizes = [16, 1], strides = [1, 1]} : vector<16x5xf32> to vector<16x1xf32>
    %3 = vector.extract_strided_slice %0 {offsets = [0, 0], sizes = [16, 128], strides = [1, 1]} : vector<16x512xf32> to vector<16x128xf32>
    %4 = vector.broadcast %2 : vector<16x1xf32> to vector<16x128xf32>
    %5 = arith.mulf %4, %3 : vector<16x128xf32>
    %cst = arith.constant 1.000000e+00 : f32
    %6 = vector.broadcast %cst : f32 to vector<16x128xf32>
    %7 = arith.subf %6, %5 : vector<16x128xf32>
    %8 = vector.extract_strided_slice %1 {offsets = [0, 1], sizes = [16, 1], strides = [1, 1]} : vector<16x5xf32> to vector<16x1xf32>
    %9 = vector.extract_strided_slice %0 {offsets = [0, 128], sizes = [16, 128], strides = [1, 1]} : vector<16x512xf32> to vector<16x128xf32>
    %10 = vector.broadcast %8 : vector<16x1xf32> to vector<16x128xf32>
    %11 = arith.mulf %10, %9 : vector<16x128xf32>
    %cst_3 = arith.constant 1.000000e+00 : f32
    %12 = vector.broadcast %cst_3 : f32 to vector<16x128xf32>
    %13 = arith.subf %12, %11 : vector<16x128xf32>
    %14 = arith.mulf %7, %13 : vector<16x128xf32>
    %15 = vector.extract_strided_slice %1 {offsets = [0, 2], sizes = [16, 1], strides = [1, 1]} : vector<16x5xf32> to vector<16x1xf32>
    %16 = vector.extract_strided_slice %0 {offsets = [0, 256], sizes = [16, 128], strides = [1, 1]} : vector<16x512xf32> to vector<16x128xf32>
    %17 = vector.broadcast %15 : vector<16x1xf32> to vector<16x128xf32>
    %18 = arith.mulf %17, %16 : vector<16x128xf32>
    %cst_4 = arith.constant 1.000000e+00 : f32
    %19 = vector.broadcast %cst_4 : f32 to vector<16x128xf32>
    %20 = arith.subf %19, %18 : vector<16x128xf32>
    %21 = arith.mulf %14, %20 : vector<16x128xf32>
    %22 = vector.extract_strided_slice %1 {offsets = [0, 3], sizes = [16, 1], strides = [1, 1]} : vector<16x5xf32> to vector<16x1xf32>
    %23 = vector.extract_strided_slice %0 {offsets = [0, 384], sizes = [16, 128], strides = [1, 1]} : vector<16x512xf32> to vector<16x128xf32>
    %24 = vector.broadcast %22 : vector<16x1xf32> to vector<16x128xf32>
    %25 = arith.mulf %24, %23 : vector<16x128xf32>
    %cst_5 = arith.constant 1.000000e+00 : f32
    %26 = vector.broadcast %cst_5 : f32 to vector<16x128xf32>
    %27 = arith.subf %26, %25 : vector<16x128xf32>
    %28 = arith.mulf %21, %27 : vector<16x128xf32>
    %c0_6 = arith.constant 0 : index
    %c0_7 = arith.constant 0 : index
    %29 = vector.load %arg4[%c0_6, %c0_7] : memref<16x128xf32, #tpu.memory_space<vmem>>, vector<16x128xf32>
    tpu.vector_store %arg4[%c0_6, %c0_7], %28 {strides = array<i32>} : memref<16x128xf32, #tpu.memory_space<vmem>>, vector<16x128xf32>,
    %cst_8 = arith.constant 0.000000e+00 : f32
    %30 = vector.broadcast %cst_8 : f32 to vector<16x128xf32>
    %c0_9 = arith.constant 0 : index
    %c0_10 = arith.constant 0 : index
    %31 = vector.load %arg5[%c0_9, %c0_10] : memref<16x128xf32, #tpu.memory_space<vmem>>, vector<16x128xf32>
    tpu.vector_store %arg5[%c0_9, %c0_10], %30 {strides = array<i32>} : memref<16x128xf32, #tpu.memory_space<vmem>>, vector<16x128xf32>,
    %32 = tpu.iota {dimensions = array<i32: 1>} : vector<16x128xi32>
    %c0_i32 = arith.constant 0 : i32
    %33 = vector.broadcast %c0_i32 : i32 to vector<16x128xi32>
    %34 = arith.cmpi eq, %32, %33 : vector<16x128xi32>
    %cst_11 = arith.constant 1.000000e+00 : f32
    %cst_12 = arith.constant 0.000000e+00 : f32
    %35 = vector.broadcast %cst_11 : f32 to vector<16x128xf32>
    %36 = vector.broadcast %cst_12 : f32 to vector<16x128xf32>
    %37 = arith.select %34, %35, %36 : vector<16x128xi1>, vector<16x128xf32>
    %38 = vector.extract_strided_slice %1 {offsets = [0, 4], sizes = [16, 1], strides = [1, 1]} : vector<16x5xf32> to vector<16x1xf32>
    %39 = vector.broadcast %38 : vector<16x1xf32> to vector<16x128xf32>
    %40 = arith.mulf %37, %39 : vector<16x128xf32>
    %cst_13 = arith.constant dense<0xFF800000> : vector<16xf32>
    %41 = vector.multi_reduction <maximumf>, %40, %cst_13 [1] : vector<16x128xf32> to vector<16xf32>
    %42 = vector.shape_cast %41 : vector<16xf32> to vector<16x1xf32>
    %43 = vector.broadcast %42 : vector<16x1xf32> to vector<16x128xf32>
    %44 = arith.subf %40, %43 : vector<16x128xf32>
    %45 = math.exp %44 : vector<16x128xf32>
    %cst_14 = arith.constant dense<0.000000e+00> : vector<16xf32>
    %46 = vector.multi_reduction <add>, %45, %cst_14 [1] : vector<16x128xf32> to vector<16xf32>
    %47 = vector.shape_cast %46 : vector<16xf32> to vector<16x1xf32>
    %48 = vector.broadcast %47 : vector<16x1xf32> to vector<16x128xf32>
    %49 = arith.divf %45, %48 : vector<16x128xf32>
    %c0_15 = arith.constant 0 : index
    %c0_16 = arith.constant 0 : index
    %50 = vector.load %arg3[%c0_15, %c0_16] : memref<16x128xf32, #tpu.memory_space<vmem>>, vector<16x128xf32>
    tpu.vector_store %arg3[%c0_15, %c0_16], %49 {strides = array<i32>} : memref<16x128xf32, #tpu.memory_space<vmem>>, vector<16x128xf32>,
    return
  }
  func.func @transform_0(%arg0: i32) -> (i32, i32) {
    %c0_i32 = arith.constant 0 : i32
    %c0_i32_0 = arith.constant 0 : i32
    return %arg0, %c0_i32 : i32, i32
  }
  func.func @transform_1(%arg0: i32) -> (i32, i32) {
    %c0_i32 = arith.constant 0 : i32
    %c0_i32_0 = arith.constant 0 : i32
    return %arg0, %c0_i32 : i32, i32
  }
  func.func @transform_2(%arg0: i32) -> (i32, i32) {
    %c0_i32 = arith.constant 0 : i32
    %c0_i32_0 = arith.constant 0 : i32
    return %arg0, %c0_i32 : i32, i32
  }
  func.func @transform_3(%arg0: i32) -> (i32, i32) {
    %c0_i32 = arith.constant 0 : i32
    %c0_i32_0 = arith.constant 0 : i32
    return %arg0, %c0_i32 : i32, i32
  }
  func.func @transform_4(%arg0: i32) -> (i32, i32) {
    %c0_i32 = arith.constant 0 : i32
    %c0_i32_0 = arith.constant 0 : i32
    return %arg0, %c0_i32 : i32, i32
  }
}

</mosaic_0001>

<bundles_post_ra>
// kernel: tpu_custom_call.1
= control target key start
LH: loop header
LB: loop body
LE: loop exit
PB: predicated region body
PF: predicated region fallthrough
CT: control target
= control target key end

     0   :  { %10 = vsyncpa [#allocation3], 0  ;;  %s365_s0 = inlined_call_operand.hbm [shape: f32[16,512], index: 0, kind: input, shape index: {}]   ;;  %s366_s1 = inlined_call_operand.vmem [shape: f32[16,5], index: 1, kind: input, shape index: {}]   ;;  %s367_s2 = inlined_call_operand.hbm [shape: f32[16,128], index: 2, kind: output, shape index: {0}]   ;;  %s368_s3 = inlined_call_operand.hbm [shape: f32[16,128], index: 3, kind: output, shape index: {1}]   ;;  %s369_s4 = inlined_call_operand.hbm [shape: f32[16,128], index: 4, kind: output, shape index: {2}]  }
   0x1   :  { %11 = vsyncpa [#allocation4], 0 }
   0x2   :  { %12 = vsyncpa [#allocation7], 0  ;;  %s297_s15 = smov [#allocation2]  }
   0x3   :  { %s18_s16 = sshll.u32 %s297_s15, 4  ;;  %s19_s16 = int_to_ptr.vmem [resolvable:$true] %s18_s16 }
   0x4   :  { %s219_s17 = scalar_lea.vmem %s19_s16, 1024  ;;  %p224_p1 = scmp.lt.s32.totalorder %s19_s16, %s19_s16 }
   0x5   :  { %p220_p0 = scmp.ne.s32.totalorder %s19_s16, %s219_s17  ;;  %p225_p2 = scmp.lt.s32.totalorder %s219_s17, %s219_s17 }
   0x7   :  { %p226_p3 = por %p225_p2, %p224_p1 }
   0x9   :  { %p227_p4 = pnand %p226_p3, %p220_p0 }
   0xb   :  { %230 = shalt.err (!%p227_p4)
}
   0xc   :  { %s298_s18 = smov 512   ;;  %s299_s19 = smov 32  }
   0xd   :  { %24 = dma.hbm_to_vmem [thread:$0]  %s365_s0, 1024, %s19_s16, [#allocation3], %s298_s18, %s298_s18, %s299_s19  }
   0xe   :  { %291 = dma.done.wait [#allocation3], 1024  }
   0xf   :  { %292 = vsyncadd [#allocation3], 4294966272  ;;  %v300_v0 = vmov 4   ;;  %v301_v1 = vmov 0   ;;  %v302_v2 = vmov 0.0   ;;  %v38_v3 = vld [vmem:[%s366_s1] sm:$0xff]  ;;  %v100_v6 = vlaneseq }
  0x10   :  { %196 = vset.pattern.permute.xlu0 %v300_v0  ;;  %197 = vset.pattern.permute.xlu1 %v301_v1  ;;  %98 = vst [vmem:[#allocation8] sm:$0xff] %v302_v2  ;;  %99 = vst [vmem:[#allocation8 + $0x8] sm:$0xff] %v302_v2  ;;  %v39_v4 = vld [vmem:[%s366_s1 + $0x8] sm:$0xff]  ;;  %v303_v5 = vmov 2   ;;  %v304_v13 = vmov 1   ;;  %v305_v14 = vmov 3  }
  0x11   :  { %105 = vperm.xlu0 %196, %v38_v3   ;;  %42 = vperm.xlu1 %197, %v38_v3   ;;  %v101_v7 = vand.u32 127, %v100_v6  ;;  %v35_v28 = vld [vmem:[#allocation2 + $0x28] sm:$0xff]  ;;  %v34_v29 = vld [vmem:[#allocation2 + $0x20] sm:$0xff]  ;;  %v36_v31 = vld [vmem:[#allocation2 + $0x30] sm:$0xff]  ;;  %s306_s0 = smov [#allocation6]   ;;  %s307_s26 = smov [#allocation8]  }
  0x12   :  { %v31_v30 = vld [vmem:[#allocation2 + $0x8] sm:$0xff]  ;;  %v30_v34 = vld [vmem:[#allocation2] sm:$0xff]  ;;  %v33_v42 = vld [vmem:[#allocation2 + $0x18] sm:$0xff]  ;;  %s151_s1 = sshll.u32 %s306_s0, 4  ;;  %s163_s27 = sshll.u32 %s307_s26, 4  ;;  %s152_s1 = int_to_ptr.vmem [resolvable:$true] %s151_s1  ;;  %s164_s27 = int_to_ptr.vmem [resolvable:$true] %s163_s27 }
  0x13   :  { %vm102_vm0 = vcmp.eq.s32.totalorder %v101_v7, 0  ;;  %v37_v43 = vld [vmem:[#allocation2 + $0x38] sm:$0xff]  ;;  %v32_v44 = vld [vmem:[#allocation2 + $0x10] sm:$0xff]  ;;  %s308_s28 = smov [#allocation5]   ;;  %s231_s30 = scalar_lea.vmem %s152_s1, 256 }
  0x14   :  { %v103_v8 = vsel %vm102_vm0, 1.0, %v302_v2  ;;  %s139_s29 = sshll.u32 %s308_s28, 4  ;;  %p232_p5 = scmp.ne.s32.totalorder %s152_s1, %s231_s30  ;;  %s348_s29 = int_to_ptr.vmem [resolvable:$true] %s139_s29 }
  0x15   :  { %109 = vperm.xlu0 %196, %v39_v4   ;;  %p236_p6 = scmp.lt.s32.totalorder %s152_s1, %s152_s1  ;;  %p237_p7 = scmp.lt.s32.totalorder %s231_s30, %s231_s30 }
  0x17   :  { %p238_p8 = por %p237_p7, %p236_p6 }
  0x19   :  { %199 = vset.pattern.permute.xlu0 %v303_v5  ;;  %p239_p9 = pnand %p238_p8, %p232_p5 }
  0x8c   :  { %v106_v9 = vpop.permute.xlu0 %105  ;;  %v43_v15 = vpop.permute.xlu1 %42 }
  0x8d   :  { %v112_v10 = vmul.f32 %v106_v9, %v103_v8  ;;  %v50_v39 = vmul.f32 %v43_v15, %v30_v34 }
  0x8f   :  { %114 = vmax.xlane.f32.xlu1 %v112_v10  ;;  %v52_v48 = vsub.f32 1.0, %v50_v39 }
  0x90   :  { %v110_v11 = vpop.permute.xlu0 %109 }
  0x91   :  { %v113_v12 = vmul.f32 %v110_v11, %v103_v8 }
  0x93   :  { %116 = vmax.xlane.f32.xlu1 %v113_v12 }
  0xa4   :  { %47 = vperm.xlu1 %197, %v39_v4  }
  0xa8   :  { %198 = vset.pattern.permute.xlu1 %v304_v13 }
  0xa9   :  { %55 = vperm.xlu1 %198, %v38_v3  }
  0xad   :  { %59 = vperm.xlu1 %198, %v39_v4  }
  0xb1   :  { %200 = vset.pattern.permute.xlu1 %v303_v5 }
  0xb2   :  { %73 = vperm.xlu1 %200, %v39_v4  }
  0xb6   :  { %201 = vset.pattern.permute.xlu1 %v305_v14 }
  0xb7   :  { %83 = vperm.xlu1 %201, %v38_v3  }
 0x118   :  { %v115_v16 = vpop.xlane.xlu1 %114 }
 0x119   :  { %v118_v17 = vsub.f32 %v112_v10, %v115_v16 }
 0x11b   :  { %v120_v18 = vmul.f32 1.442695, %v118_v17 }
 0x11c   :  { %v117_v19 = vpop.xlane.xlu1 %116 }
 0x11d   :  { %203 = vpow2.f32 %v120_v18  ;;  %v119_v20 = vsub.f32 %v113_v12, %v117_v19 }
 0x11f   :  { %v122_v21 = vmul.f32 1.442695, %v119_v20 }
 0x120   :  { %v48_v24 = vpop.permute.xlu1 %47 }
 0x121   :  { %205 = vpow2.f32 %v122_v21  ;;  %v51_v36 = vmul.f32 %v48_v24, %v34_v29 }
 0x123   :  { %v53_v45 = vsub.f32 1.0, %v51_v36 }
 0x124   :  { %v56_v25 = vpop.permute.xlu1 %55 }
 0x125   :  { %v62_v37 = vmul.f32 %v56_v25, %v31_v30 }
 0x127   :  { %v64_v46 = vsub.f32 1.0, %v62_v37 }
 0x128   :  { %v60_v26 = vpop.permute.xlu1 %59 }
 0x129   :  { %v63_v35 = vmul.f32 %v60_v26, %v35_v28  ;;  %v66_v55 = vmul.f32 %v64_v46, %v52_v48 }
 0x12a   :  { %v204_v22 = vpop.eup %203 }
 0x12b   :  { %124 = vadd.xlane.f32.xlu0 %v204_v22  ;;  %v65_v41 = vsub.f32 1.0, %v63_v35 }
 0x12d   :  { %v74_v27 = vpop.permute.xlu1 %73  ;;  %v67_v51 = vmul.f32 %v65_v41, %v53_v45 }
 0x12e   :  { %v345_v23 = vpop.eup %205  ;;  %v77_v38 = vmul.f32 %v74_v27, %v36_v31 }
 0x12f   :  { %126 = vadd.xlane.f32.xlu1 %v345_v23 }
 0x130   :  { %v79_v47 = vsub.f32 1.0, %v77_v38 }
 0x132   :  { %v84_v32 = vpop.permute.xlu1 %83  ;;  %v81_v56 = vmul.f32 %v79_v47, %v67_v51 }
 0x133   :  { %v90_v52 = vmul.f32 %v84_v32, %v33_v42 }
 0x135   :  { %v92_v59 = vsub.f32 1.0, %v90_v52 }
 0x140   :  { %87 = vperm.xlu1 %201, %v39_v4  }
 0x141   :  { %69 = vperm.xlu0 %199, %v38_v3  }
 0x145   :  { %202 = vset.pattern.permute.xlu0 %v300_v0 }
 0x1b4   :  { %v125_v33 = vpop.xlane.xlu0 %124 }
 0x1b5   :  { %207 = vrcp.f32 %v125_v33 }
 0x1b8   :  { %v127_v40 = vpop.xlane.xlu1 %126 }
 0x1b9   :  { %209 = vrcp.f32 %v127_v40 }
 0x1bc   :  { %v88_v49 = vpop.permute.xlu1 %87  ;;  %v70_v50 = vpop.permute.xlu0 %69 }
 0x1bd   :  { %v91_v53 = vmul.f32 %v88_v49, %v37_v43  ;;  %v76_v54 = vmul.f32 %v70_v50, %v32_v44 }
 0x1bf   :  { %v93_v57 = vsub.f32 1.0, %v91_v53  ;;  %v78_v58 = vsub.f32 1.0, %v76_v54 }
 0x1c1   :  { %v95_v60 = vmul.f32 %v93_v57, %v81_v56  ;;  %v80_v61 = vmul.f32 %v78_v58, %v66_v55 }
 0x1c2   :  { %v208_v62 = vpop.eup %207 }
 0x1c3   :  { %97 = vst [vmem:[#allocation6 + $0x8] sm:$0xff] %v95_v60  ;;  %v94_v63 = vmul.f32 %v92_v59, %v80_v61  ;;  %v129_v0 = vmul.f32 %v208_v62, %v204_v22 }
 0x1c5   :  { %96 = vst [vmem:[#allocation6] sm:$0xff] %v94_v63  ;;  %132 = vst [vmem:[#allocation5] sm:$0xff] %v129_v0 }
 0x1c6   :  { %v210_v1 = vpop.eup %209 }
 0x1c7   :  { %242 = shalt.err (!%p239_p9)
}
 0x1c8   :  { %s309_s5 = smov 128   ;;  %s310_s6 = smov 8   ;;  %v131_v2 = vmul.f32 %v210_v1, %v345_v23 }
 0x1c9   :  { %157 = dma.vmem_to_hbm [thread:$0]  %s152_s1, 256, %s368_s3, [#allocation7], %s309_s5, %s309_s5, %s310_s6  }
 0x1ca   :  { %s251_s9 = scalar_lea.vmem %s164_s27, 256  ;;  %p256_p11 = scmp.lt.s32.totalorder %s164_s27, %s164_s27 }
 0x1cb   :  { %p252_p10 = scmp.ne.s32.totalorder %s164_s27, %s251_s9  ;;  %p257_p12 = scmp.lt.s32.totalorder %s251_s9, %s251_s9 }
 0x1cd   :  { %p258_p13 = por %p257_p12, %p256_p11 }
 0x1cf   :  { %p259_p0 = pnand %p258_p13, %p252_p10 }
 0x1d1   :  { %262 = shalt.err (!%p259_p0)
}
 0x1d2   :  { %169 = dma.vmem_to_hbm [thread:$0]  %s164_s27, 256, %s369_s4, [#allocation7], %s309_s5, %s309_s5, %s310_s6   ;;  %133 = vst [vmem:[#allocation5 + $0x8] sm:$0xff] %v131_v2 }
 0x1d3   :  { %s271_s12 = scalar_lea.vmem %s348_s29, 256  ;;  %p276_p2 = scmp.lt.s32.totalorder %s348_s29, %s348_s29 }
 0x1d4   :  { %p272_p1 = scmp.ne.s32.totalorder %s348_s29, %s271_s12  ;;  %p277_p3 = scmp.lt.s32.totalorder %s271_s12, %s271_s12 }
 0x1d6   :  { %p278_p4 = por %p277_p3, %p276_p2 }
 0x1d8   :  { %p279_p5 = pnand %p278_p4, %p272_p1 }
 0x1da   :  { %282 = shalt.err (!%p279_p5)
}
 0x1db   :  { %145 = dma.vmem_to_hbm [thread:$0]  %s348_s29, 256, %s367_s2, [#allocation4], %s309_s5, %s309_s5, %s310_s6  }
 0x1dc   :  { %293 = dma.done.wait [#allocation4], 256  }
 0x1dd   :  { %294 = vsyncadd [#allocation4], 4294967040 }
 0x1de   :  { %295 = dma.done.wait [#allocation7], 512  }
 0x1df   :  { %296 = vsyncadd [#allocation7], 4294966784 }
 0x1e0   :  { %179 = vsyncpa [#allocation3], 1 }
 0x1e1   :  { %180 = vsyncpa [#allocation4], 1 }
 0x1e2   :  { %181 = vsyncpa [#allocation7], 1 }

</bundles_post_ra>
